<compile_context>
chip_gen: v6e
topology: v6e:2x2x1
jax: 0.10.0
libtpu: 0.0.40
codegen_flags: <defaults>
</compile_context>

<pallas_src>
import functools
import math

import jax
import jax.numpy as jnp
from jax.experimental import pallas as pl
from jax.experimental.pallas import tpu as pltpu


# ---------------------------------------------------------------------------
# Kernel
# ---------------------------------------------------------------------------

def _dice_kernel(p_ref, t_ref, num_ref, den_ref, *, exponent, l, tl, ragged):
    """Accumulates per-row num = sum(p*t) and den = sum(p^e + t^e) over L tiles."""
    k = pl.program_id(1)
    last = pl.num_programs(1) - 1

    @pl.when(k == 0)
    def _init():
        num_ref[...] = jnp.zeros_like(num_ref)
        den_ref[...] = jnp.zeros_like(den_ref)

    def _accumulate(mask_tail):
        p = p_ref[...].astype(jnp.float32)
        t = t_ref[...].astype(jnp.float32)
        if mask_tail:
            # Last L tile extends past the array; Pallas pads the block with
            # unspecified data, so zero the out-of-range lanes.
            rem = l - k * tl
            lane = jax.lax.broadcasted_iota(jnp.int32, p.shape, 1)
            valid = lane < rem
            p = jnp.where(valid, p, 0.0)
            t = jnp.where(valid, t, 0.0)
        pt = p * t
        num_ref[...] += jnp.sum(pt, axis=1, keepdims=True)
        if exponent == 2:
            # p^2 + t^2 == (p + t)^2 - 2*p*t ; the -2*num fixup happens once at
            # finalize, saving one mul and one add per element in the hot loop.
            s = p + t
            den_ref[...] += jnp.sum(s * s, axis=1, keepdims=True)
        elif exponent == 1:
            den_ref[...] += jnp.sum(p + t, axis=1, keepdims=True)
        else:
            den_ref[...] += jnp.sum(p ** exponent + t ** exponent,
                                    axis=1, keepdims=True)

    if ragged:
        # Masking only on the final (ragged) tile; full tiles stay lean.
        @pl.when(k < last)
        def _full_tiles():
            _accumulate(False)

        @pl.when(k == last)
        def _tail_tile():
            _accumulate(True)
    else:
        _accumulate(False)

    if exponent == 2:
        @pl.when(k == last)
        def _fixup():
            den_ref[...] = den_ref[...] - 2.0 * num_ref[...]


# ---------------------------------------------------------------------------
# Tiling helpers
# ---------------------------------------------------------------------------

def _round_up(x, m):
    return -(-x // m) * m


def _sublane_multiple(itemsize):
    # f32 -> 8 sublanes, bf16/f16 -> 16, int8/bool/fp8 -> 32
    return 8 * max(1, 4 // max(1, itemsize))


def _default_target_bytes():
    """Per-input-block DMA budget; 2 inputs x 2 buffers must fit scoped VMEM."""
    try:
        kind = jax.devices()[0].device_kind.lower()
    except Exception:
        return 2 << 20
    if "v7" in kind or "v6" in kind:
        # 2 x 2 x 4 MiB = 16 MiB, half the 32 MiB default scoped limit.
        # Bigger tiles amortize the ~0.35 us/step overhead at v7x's 3.2 TB/s.
        return 4 << 20
    # v5e (16 MiB scoped default) and anything unknown: 2 x 2 x 2 MiB = 8 MiB.
    return 2 << 20


def _choose_fold(n, l, sub):
    """Fold factor f for reshaping (n, l) -> (n*f, l/f).

    Makes the row count a multiple of the sublane packing (dense vregs, correct
    VMEM footprint) and, when possible, >= 2 blocks on the parallel N axis so
    v7x's second TensorCore can engage. Requires f | l and l/f >= 128.
    """
    if n >= 2 * sub and n % sub == 0:
        return 1
    base = 1 if n % sub == 0 else sub // math.gcd(n, sub)
    for f in (2 * base, base):
        if f > 1 and l % f == 0 and l // f >= 128 and (n * f) % sub == 0:
            return f
    return 1


def _choose_tiles(n, l, itemsize_p, itemsize_t, target_bytes):
    itemsize = max(itemsize_p, itemsize_t)
    sub = max(_sublane_multiple(itemsize_p), _sublane_multiple(itemsize_t))

    tn = n if n < sub else sub
    tn_pad = _round_up(tn, sub)          # VMEM blocks are padded to (sub, 128)
    l_pad = _round_up(l, 128)

    if l <= 128 or tn_pad * l_pad * itemsize <= target_bytes:
        tl = l                           # a single full-L tile
    else:
        tl = max(128, (target_bytes // (tn_pad * itemsize)) // 128 * 128)
        tl = min(tl, (l // 128) * 128)

    if n > sub and tl == l:
        # Full-L tiles: grow the N block toward target_bytes per step, but keep
        # >= 2 blocks on the parallel axis when possible (v7x has 2 TCs).
        per_row_bytes = l_pad * itemsize
        tn_cap = (n // sub) * sub
        tn_want = max(sub, (target_bytes // max(1, per_row_bytes)) // sub * sub)
        tn_half = max(sub, _round_up(-(-n // 2), sub))
        tn = min(tn_cap, tn_want, tn_half)
    return tn, tl


# ---------------------------------------------------------------------------
# Wrapper (== BinaryDiceLoss.forward)
# ---------------------------------------------------------------------------

def binary_dice_loss(predict, target, *, smooth=1.0, exponent=2,
                     reduction='mean', loss_weight=1.0,
                     tile_l=None, target_bytes=None):
    assert predict.shape[0] == target.shape[0], \
        "predict & target batch size don't match"
    n = predict.shape[0]
    p = predict.reshape(n, -1)   # == predict.contiguous().view(N, -1)
    t = target.reshape(n, -1)
    l = p.shape[1]
    assert t.shape[1] == l, \
        "predict & target must have the same number of elements per row"

    # Integral exponents as Python ints -> explicit multiplies in the kernel.
    if float(exponent) == int(exponent):
        exponent = int(exponent)

    sub = max(_sublane_multiple(p.dtype.itemsize),
              _sublane_multiple(t.dtype.itemsize))

    # Row folding: (n, l) -> (n*f, l/f). Row-major reshape is layout-free; the
    # f partial (num, den) per original row are summed back in the wrapper.
    f = _choose_fold(n, l, sub)
    nf, lf = n * f, l // f
    if f > 1:
        p = p.reshape(nf, lf)
        t = t.reshape(nf, lf)

    if target_bytes is None:
        target_bytes = _default_target_bytes()
    tn, tl = _choose_tiles(nf, lf, p.dtype.itemsize, t.dtype.itemsize,
                           target_bytes)
    if tile_l is not None:  # explicit override (testing / tuning)
        tl = max(128, (min(tile_l, lf) // 128) * 128)
        if tl >= lf:
            tl = lf

    grid_n = pl.cdiv(nf, tn)
    grid_l = pl.cdiv(lf, tl)
    ragged = (lf % tl) != 0

    kernel = functools.partial(_dice_kernel, exponent=exponent,
                               l=lf, tl=tl, ragged=ragged)

    flops_per_elem = 5 if exponent == 2 else (4 if exponent == 1 else 7)
    cost = pl.CostEstimate(
        flops=flops_per_elem * n * l,
        transcendentals=0 if exponent in (1, 2) else 2 * n * l,
        bytes_accessed=n * l * (p.dtype.itemsize + t.dtype.itemsize) + 8 * nf)

    num2d, den2d = pl.pallas_call(
        kernel,
        out_shape=(jax.ShapeDtypeStruct((nf, 1), jnp.float32),
                   jax.ShapeDtypeStruct((nf, 1), jnp.float32)),
        grid=(grid_n, grid_l),
        in_specs=[pl.BlockSpec((tn, tl), lambda i, k: (i, k)),
                  pl.BlockSpec((tn, tl), lambda i, k: (i, k))],
        out_specs=(pl.BlockSpec((tn, 1), lambda i, k: (i, 0)),
                   pl.BlockSpec((tn, 1), lambda i, k: (i, 0))),
        compiler_params=pltpu.CompilerParams(
            dimension_semantics=("parallel", "arbitrary")),
        cost_estimate=cost,
    )(p, t)

    num = num2d[:, 0]
    den = den2d[:, 0]
    if f > 1:
        num = num.reshape(n, f).sum(axis=1)
        den = den.reshape(n, f).sum(axis=1)

    # Tiny [N]-sized epilogue, matching the PyTorch reference semantics.
    loss = loss_weight * (1.0 - (num + smooth) / (den + smooth))

    if reduction == 'mean':
        return jnp.mean(loss)
    elif reduction == 'sum':
        return jnp.sum(loss)
    elif reduction == 'none':
        return loss
    else:
        raise Exception('Unexpected reduction {}'.format(reduction))


# ---------------------------------------------------------------------------
# Pure-JAX reference & tests
# ---------------------------------------------------------------------------

def _reference(predict, target, smooth=1.0, exponent=2, reduction='mean',
               loss_weight=1.0):
    n = predict.shape[0]
    p = predict.reshape(n, -1).astype(jnp.float32)
    t = target.reshape(n, -1).astype(jnp.float32)
    num = jnp.sum(p * t, axis=1) + smooth
    den = jnp.sum(p ** exponent + t ** exponent, axis=1) + smooth
    loss = loss_weight * (1.0 - num / den)
    if reduction == 'mean':
        return jnp.mean(loss)
    if reduction == 'sum':
        return jnp.sum(loss)
    return loss


if __name__ == "__main__":
    key = jax.random.PRNGKey(0)
    k1, k2 = jax.random.split(key)

    # predict: sigmoid-like probabilities, target: binary mask; shape [N, C, H, W]
    predict = jax.nn.sigmoid(jax.random.normal(k1, (2, 4, 16, 16), jnp.float32))
    target = (jax.random.uniform(k2, (2, 4, 16, 16)) > 0.5).astype(jnp.float32)

    out = jax.block_until_ready(binary_dice_loss(predict, target))
    ref = _reference(predict, target)
    assert jnp.allclose(out, ref, atol=1e-5, rtol=1e-5), (out, ref)

    # 'none' reduction path
    out_none = jax.block_until_ready(
        binary_dice_loss(predict, target, reduction='none'))
    ref_none = _reference(predict, target, reduction='none')
    assert jnp.allclose(out_none, ref_none, atol=1e-5, rtol=1e-5)

    # 'sum' reduction + non-default smooth / loss_weight
    out_sum = jax.block_until_ready(
        binary_dice_loss(predict, target, reduction='sum',
                         smooth=0.5, loss_weight=2.0))
    ref_sum = _reference(predict, target, reduction='sum',
                         smooth=0.5, loss_weight=2.0)
    assert jnp.allclose(out_sum, ref_sum, atol=1e-5, rtol=1e-5)

    # ragged / multi-tile L path (gated masking of only the last tile)
    p3 = jax.nn.sigmoid(jax.random.normal(k1, (2, 3, 13, 17), jnp.float32))  # L=663
    t3 = (jax.random.uniform(k2, (2, 3, 13, 17)) > 0.5).astype(jnp.float32)
    out3 = jax.block_until_ready(
        binary_dice_loss(p3, t3, reduction='none', tile_l=256))
    ref3 = _reference(p3, t3, reduction='none')
    assert jnp.allclose(out3, ref3, atol=1e-5, rtol=1e-5), (out3, ref3)

    # row folding + multiple divisible L tiles (no masking) + grid_n >= 2
    p4 = jax.nn.sigmoid(jax.random.normal(k1, (4, 8, 32, 32), jnp.float32))  # L=8192
    t4 = (jax.random.uniform(k2, (4, 8, 32, 32)) > 0.5).astype(jnp.float32)
    out4 = jax.block_until_ready(
        binary_dice_loss(p4, t4, reduction='none', tile_l=512))
    ref4 = _reference(p4, t4, reduction='none')
    assert jnp.allclose(out4, ref4, atol=1e-5, rtol=1e-5), (out4, ref4)

    # native-dtype (bf16) inputs: no wrapper upcast, f32 accumulation in-kernel
    pb = predict.astype(jnp.bfloat16)
    tb = target.astype(jnp.bfloat16)
    outb = jax.block_until_ready(binary_dice_loss(pb, tb))
    refb = _reference(pb, tb)
    assert jnp.allclose(outb, refb, atol=1e-4, rtol=1e-4), (outb, refb)

    # narrow (int8) target mask: 4x less HBM traffic for the t stream
    p5 = jax.nn.sigmoid(jax.random.normal(k1, (2, 4, 32, 32), jnp.float32))  # L=4096
    t5 = (jax.random.uniform(k2, (2, 4, 32, 32)) > 0.5).astype(jnp.int8)
    out5 = jax.block_until_ready(binary_dice_loss(p5, t5, reduction='none'))
    ref5 = _reference(p5, t5, reduction='none')
    assert jnp.allclose(out5, ref5, atol=1e-5, rtol=1e-5), (out5, ref5)

    print("KERNEL_OK")
</pallas_src>

<mosaic_0001>
module attributes {stable_mosaic.version = 11 : i64} {
  func.func @_dice_kernel(%arg0: i32, %arg1: i32, %arg2: memref<8x128xf32, #tpu.memory_space<vmem>>, %arg3: memref<8x128xf32, #tpu.memory_space<vmem>>, %arg4: memref<8x1xf32, #tpu.memory_space<vmem>>, %arg5: memref<8x1xf32, #tpu.memory_space<vmem>>) attributes {dimension_semantics = [#tpu.dimension_semantics<parallel>, #tpu.dimension_semantics<arbitrary>], iteration_bounds = array<i64: 2, 1>, scalar_prefetch = 0 : i64, scratch_operands = 0 : i64, tpu.core_type = #tpu.core_type<tc>, window_params = [{transform_indices = @transform_0, window_bounds = array<i64: 8, 128>}, {transform_indices = @transform_1, window_bounds = array<i64: 8, 128>}, {transform_indices = @transform_2, window_bounds = array<i64: 8, 1>}, {transform_indices = @transform_3, window_bounds = array<i64: 8, 1>}]} {
    %c0_i32 = arith.constant 0 : i32
    %0 = arith.cmpi eq, %arg1, %c0_i32 : i32
    %1 = arith.extui %0 : i1 to i32
    %c0_i32_0 = arith.constant 0 : i32
    %2 = arith.cmpi ne, %1, %c0_i32_0 : i32
    scf.if %2 {
      %cst_15 = arith.constant 0.000000e+00 : f32
      %21 = vector.broadcast %cst_15 : f32 to vector<8x1xf32>
      %c0_16 = arith.constant 0 : index
      %c0_17 = arith.constant 0 : index
      %22 = vector.load %arg4[%c0_16, %c0_17] : memref<8x1xf32, #tpu.memory_space<vmem>>, vector<8x1xf32>
      tpu.vector_store %arg4[%c0_16, %c0_17], %21 {strides = array<i32>} : memref<8x1xf32, #tpu.memory_space<vmem>>, vector<8x1xf32>,
      %cst_18 = arith.constant 0.000000e+00 : f32
      %23 = vector.broadcast %cst_18 : f32 to vector<8x1xf32>
      %c0_19 = arith.constant 0 : index
      %c0_20 = arith.constant 0 : index
      %24 = vector.load %arg5[%c0_19, %c0_20] : memref<8x1xf32, #tpu.memory_space<vmem>>, vector<8x1xf32>
      tpu.vector_store %arg5[%c0_19, %c0_20], %23 {strides = array<i32>} : memref<8x1xf32, #tpu.memory_space<vmem>>, vector<8x1xf32>,
    } else {
    }
    %c0 = arith.constant 0 : index
    %c0_1 = arith.constant 0 : index
    %3 = vector.load %arg2[%c0, %c0_1] : memref<8x128xf32, #tpu.memory_space<vmem>>, vector<8x128xf32>
    %c0_2 = arith.constant 0 : index
    %c0_3 = arith.constant 0 : index
    %4 = vector.load %arg3[%c0_2, %c0_3] : memref<8x128xf32, #tpu.memory_space<vmem>>, vector<8x128xf32>
    %5 = arith.mulf %3, %4 : vector<8x128xf32>
    %c0_4 = arith.constant 0 : index
    %c0_5 = arith.constant 0 : index
    %6 = vector.load %arg4[%c0_4, %c0_5] : memref<8x1xf32, #tpu.memory_space<vmem>>, vector<8x1xf32>
    %cst = arith.constant dense<0.000000e+00> : vector<8xf32>
    %7 = vector.multi_reduction <add>, %5, %cst [1] : vector<8x128xf32> to vector<8xf32>
    %8 = vector.shape_cast %7 : vector<8xf32> to vector<8x1xf32>
    %9 = arith.addf %6, %8 : vector<8x1xf32>
    %c0_6 = arith.constant 0 : index
    %c0_7 = arith.constant 0 : index
    %10 = vector.load %arg4[%c0_6, %c0_7] : memref<8x1xf32, #tpu.memory_space<vmem>>, vector<8x1xf32>
    tpu.vector_store %arg4[%c0_6, %c0_7], %9 {strides = array<i32>} : memref<8x1xf32, #tpu.memory_space<vmem>>, vector<8x1xf32>,
    %11 = arith.addf %3, %4 : vector<8x128xf32>
    %c0_8 = arith.constant 0 : index
    %c0_9 = arith.constant 0 : index
    %12 = vector.load %arg5[%c0_8, %c0_9] : memref<8x1xf32, #tpu.memory_space<vmem>>, vector<8x1xf32>
    %13 = arith.mulf %11, %11 : vector<8x128xf32>
    %cst_10 = arith.constant dense<0.000000e+00> : vector<8xf32>
    %14 = vector.multi_reduction <add>, %13, %cst_10 [1] : vector<8x128xf32> to vector<8xf32>
    %15 = vector.shape_cast %14 : vector<8xf32> to vector<8x1xf32>
    %16 = arith.addf %12, %15 : vector<8x1xf32>
    %c0_11 = arith.constant 0 : index
    %c0_12 = arith.constant 0 : index
    %17 = vector.load %arg5[%c0_11, %c0_12] : memref<8x1xf32, #tpu.memory_space<vmem>>, vector<8x1xf32>
    tpu.vector_store %arg5[%c0_11, %c0_12], %16 {strides = array<i32>} : memref<8x1xf32, #tpu.memory_space<vmem>>, vector<8x1xf32>,
    %c0_i32_13 = arith.constant 0 : i32
    %18 = arith.cmpi eq, %arg1, %c0_i32_13 : i32
    %19 = arith.extui %18 : i1 to i32
    %c0_i32_14 = arith.constant 0 : i32
    %20 = arith.cmpi ne, %19, %c0_i32_14 : i32
    scf.if %20 {
      %c0_15 = arith.constant 0 : index
      %c0_16 = arith.constant 0 : index
      %21 = vector.load %arg5[%c0_15, %c0_16] : memref<8x1xf32, #tpu.memory_space<vmem>>, vector<8x1xf32>
      %c0_17 = arith.constant 0 : index
      %c0_18 = arith.constant 0 : index
      %22 = vector.load %arg4[%c0_17, %c0_18] : memref<8x1xf32, #tpu.memory_space<vmem>>, vector<8x1xf32>
      %cst_19 = arith.constant 2.000000e+00 : f32
      %23 = vector.broadcast %cst_19 : f32 to vector<8x1xf32>
      %24 = arith.mulf %23, %22 : vector<8x1xf32>
      %25 = arith.subf %21, %24 : vector<8x1xf32>
      %c0_20 = arith.constant 0 : index
      %c0_21 = arith.constant 0 : index
      %26 = vector.load %arg5[%c0_20, %c0_21] : memref<8x1xf32, #tpu.memory_space<vmem>>, vector<8x1xf32>
      tpu.vector_store %arg5[%c0_20, %c0_21], %25 {strides = array<i32>} : memref<8x1xf32, #tpu.memory_space<vmem>>, vector<8x1xf32>,
    } else {
    }
    return
  }
  func.func @transform_0(%arg0: i32, %arg1: i32) -> (i32, i32) {
    %c0_i32 = arith.constant 0 : i32
    return %arg0, %arg1 : i32, i32
  }
  func.func @transform_1(%arg0: i32, %arg1: i32) -> (i32, i32) {
    %c0_i32 = arith.constant 0 : i32
    return %arg0, %arg1 : i32, i32
  }
  func.func @transform_2(%arg0: i32, %arg1: i32) -> (i32, i32) {
    %c0_i32 = arith.constant 0 : i32
    %c0_i32_0 = arith.constant 0 : i32
    return %arg0, %c0_i32 : i32, i32
  }
  func.func @transform_3(%arg0: i32, %arg1: i32) -> (i32, i32) {
    %c0_i32 = arith.constant 0 : i32
    %c0_i32_0 = arith.constant 0 : i32
    return %arg0, %c0_i32 : i32, i32
  }
}

</mosaic_0001>

<bundles_post_ra>
// kernel: tpu_custom_call.1
= control target key start
LH: loop header
LB: loop body
LE: loop exit
PB: predicated region body
PF: predicated region fallthrough
CT: control target
= control target key end

     0   :  { %9 = vsyncpa [#allocation3], 0  ;;  %s757_s0 = inlined_call_operand.hbm [shape: f32[16,128], index: 0, kind: input, shape index: {}]   ;;  %s758_s1 = inlined_call_operand.hbm [shape: f32[16,128], index: 1, kind: input, shape index: {}]   ;;  %s759_s2 = inlined_call_operand.vmem [shape: f32[16,1], index: 2, kind: output, shape index: {0}]   ;;  %s760_s3 = inlined_call_operand.vmem [shape: f32[16,1], index: 3, kind: output, shape index: {1}]  }
   0x1   :  { %11 = vsyncpa [#allocation3 + $0x1], 0 }
   0x2   :  { %12 = vsyncpa [#allocation5], 0 }
   0x3   :  { %14 = vsyncpa [#allocation5 + $0x1], 0  ;;  %s623_s12 = smov 0   ;;  %s625_s13 = smov 0  }
   0x4   :  { %s627_s14 = smov 0   ;;  %s629_s15 = smov 0  }
   0x5   :  { %s631_s16 = smov 0   ;;  %s633_s17 = smov 0  }
   0x6 LB: > { %s412_s18 = sadd.s32 4294967295, %s598_s17   ;;  %s32_s19 = sadd.s32 1, %s594_s16  ;;  %s598_s17 = sphi %s633_s17, %s20_s17   ;;  %s594_s16 = sphi %s631_s16, %s769_s16   ;;  %s590_s15 = sphi %s629_s15, %s768_s15   ;;  %s586_s14 = sphi %s627_s14, %s767_s14   ;;  %s582_s13 = sphi %s625_s13, %s766_s13   ;;  %s578_s12 = sphi %s623_s12, %s765_s12  }
   0x7   : > { %p34_p0 = scmp.ge.s32.totalorder %s32_s19, 2  ;;  %s41_s20 = sadd.s32 1, %s586_s14 }
   0x8   : > { %p48_p1 = scmp.ne.s32.totalorder %s586_s14, %s582_s13  ;;  %p49_p2 = scmp.eq.s32.totalorder %s598_s17, 0 }
   0x9   : > { %s771_s19 = smov (%p34_p0, %s32_s19), 0  ;;  %p54_p4 = scmp.ne.s32.totalorder %s582_s13, %s578_s12 }
   0xa   : > { %p659_p3 = por %p49_p2, %p48_p1  ;;  %s36_s22 = ssub.s32 %s594_s16, %s771_s19 }
   0xb   : > { %p55_p5 = scmp.eq.s32.totalorder %s412_s18, 0  ;;  %p39_p6 = scmp.eq.s32.totalorder %s36_s22, 0 }
   0xc   : > { %p438_p8 = scmp.lt.s32.totalorder %s598_s17, 2  ;;  %s675_s25 = sand.u32 1, %s586_s14  }
   0xd   : > { %p666_p7 = por %p55_p5, %p54_p4  ;;  %s417_s26 = sshll.u32 %s594_s16, 7 }
   0xe   : > { %s672_s24 = scalar_select %p39_p6, %s586_s14, %s41_s20  }
   0xf   : > { %s416_s27 = sshll.u32 %s675_s25, 3  ;;  %s168_s30 = scalar_lea.hbm %s757_s0, %s417_s26 }
  0x10   : > { %s162_s4 = scalar_lea.vmem [#allocation2], %s416_s27  ;;  %p684_p9 = pnand %p438_p8, %p659_p3 }
  0x11   : > { %s170_s5 = sshll.u32 %s162_s4, 4  ;;  %p420_p10 = scmp.ge.s32.totalorder %s598_s17, 1  ;;  %s171_s5 = int_to_ptr.vmem [resolvable:$true] %s170_s5 }
  0x12   : > { %p194_p11 = scmp.lt.s32.totalorder %s598_s17, 3  ;;  %s159_s7 = scalar_lea.sflag [#allocation3], %s675_s25 }
  0x13   : > { %p490_p12 = pneg %p684_p9  ;;  %s501_s8 = scalar_lea.vmem %s171_s5, 128 }
  0x14   : > { %p502_p13 = scmp.ne.s32.totalorder %s171_s5, %s501_s8  ;;  %s600_s9 = smov [#allocation2]  }
  0x15   : > { %s506_s10 = sshll.u32 %s600_s9, 4  ;;  %s507_s10 = int_to_ptr.vmem [resolvable:$false] %s506_s10 }
  0x16   : > { %p504_p0 = pnand %p502_p13, %p490_p12  ;;  %s508_s11 = scalar_lea.vmem %s507_s10, 256 }
  0x17   : > { %p509_p2 = scmp.lt.s32.totalorder %s171_s5, %s507_s10  ;;  %p510_p3 = scmp.lt.s32.totalorder %s508_s11, %s501_s8 }
  0x18   : > { %p505_p1 = pneg %p504_p0 }
  0x19   : > { %p511_p4 = por %p510_p3, %p509_p2 }
  0x1b   : > { %p512_p5 = pnand %p511_p4, %p505_p1 }
  0x1d   : > { %515 = shalt.err (!%p512_p5)
}
  0x1e   : > { %434 = dma.hbm_to_vmem [thread:$0]  (!%p684_p9), %s168_s30, 128, %s171_s5, %s159_s7  }
  0x1f   : > { %p702_p6 = pnand %p420_p10, %p194_p11  ;;  %s187_s21 = scalar_lea.hbm %s758_s1, %s417_s26 }
  0x20   : > { %s181_s22 = scalar_lea.vmem [#allocation4], %s416_s27  ;;  %s178_s29 = scalar_lea.sflag [#allocation5], %s675_s25 }
  0x21   : > { %s189_s28 = sshll.u32 %s181_s22, 4  ;;  %s601_s30 = smov [#allocation4]   ;;  %s190_s28 = int_to_ptr.vmem [resolvable:$true] %s189_s28 }
  0x22   : > { %s529_s4 = scalar_lea.vmem %s190_s28, 128  ;;  %s534_s5 = sshll.u32 %s601_s30, 4  ;;  %s535_s5 = int_to_ptr.vmem [resolvable:$false] %s534_s5 }
  0x23   : > { %p530_p8 = scmp.ne.s32.totalorder %s190_s28, %s529_s4  ;;  %s536_s7 = scalar_lea.vmem %s535_s5, 256 }
  0x24   : > { %p537_p10 = scmp.lt.s32.totalorder %s190_s28, %s535_s5  ;;  %p538_p11 = scmp.lt.s32.totalorder %s536_s7, %s529_s4 }
  0x25   : > { %p532_p13 = pnand %p530_p8, %p490_p12 }
  0x26   : > { %p539_p1 = por %p538_p11, %p537_p10 }
  0x27   : > { %p533_p0 = pneg %p532_p13 }
  0x29   : > { %p540_p2 = pnand %p539_p1, %p533_p0 }
  0x2b   : > { %543 = shalt.err (!%p540_p2)
}
  0x2c   : > { %437 = dma.hbm_to_vmem [thread:$0]  (!%p684_p9), %s187_s21, 128, %s190_s28, %s178_s29  }
  0x2d   : > { %198 = sbr.rel (%p702_p6) target bundleno = 211 (0xd3), region = 28  ;;  %s200_s25 = sand.u32 (!%p702_p6), 1, %s582_s13  }
  0x2e   : > { %s421_s26 = sshll.u32 (!%p702_p6), %s200_s25, 3  ;;  %s201_s27 = scalar_lea.sflag (!%p702_p6), [#allocation3], %s200_s25 }
  0x2f   : > { %s204_s8 = scalar_lea.vmem (!%p702_p6), [#allocation2], %s421_s26 }
  0x32   : > { %569 = dma.done.wait (%p666_p7), %s201_s27, 128  }
  0x33   : > { %571 = vsyncadd (%p666_p7), %s201_s27, 4294967168  ;;  %s210_s9 = scalar_lea.sflag [#allocation5], %s200_s25  ;;  %s213_s10 = scalar_lea.vmem [#allocation4], %s421_s26 }
  0x34   : > { %573 = dma.done.wait (%p666_p7), %s210_s9, 128  }
  0x35   : > { %575 = vsyncadd (%p666_p7), %s210_s9, 4294967168  ;;  %p244_p9 = scmp.lt.s32.totalorder %s590_s15, 1  ;;  %vm256_vm0 = vcmask 7168   ;;  %v602_v0 = vmov 0.0   ;;  %v259_v1 = vld [vmem:[%s204_s8] sm:$0xff]  ;;  %v260_v2 = vld [vmem:[%s213_s10] sm:$0xff] }
  0x36   : > { %v261_v3 = vmul.f32 %v260_v2, %v259_v1  ;;  %v268_v4 = vadd.f32 %v260_v2, %v259_v1 }
  0x37   : > { %s773_s15 = smov (!%p244_p9, %s590_s15), 1 }
  0x38   : > { %s423_s6 = sshll.u32 %s773_s15, 3  ;;  %263 = vadd.xlane.f32.xlu0 %v261_v3  ;;  %v270_v5 = vmul.f32 %v268_v4, %v268_v4 }
  0x39   : > { %s247_s18 = scalar_lea.vmem %s759_s2, %s423_s6  ;;  %s251_s22 = scalar_lea.vmem %s760_s3, %s423_s6 }
  0x3a   : > { %257 = vst.msk [vmem:[%s247_s18] sm:$0xff] %vm256_vm0, %v602_v0  ;;  %258 = vst.msk [vmem:[%s251_s22] sm:$0xff] %vm256_vm0, %v602_v0 }
  0x3c   : > { %271 = vadd.xlane.f32.xlu0 %v270_v5 }
  0x41   : > { %v262_v6 = vld [vmem:[%s247_s18] sm:$0xff] }
  0x42   : > { %v269_v9 = vld [vmem:[%s251_s22] sm:$0xff] }
  0xc1   : > { %v264_v7 = vpop.xlane.xlu0 %263 }
  0xc2   : > { %v265_v8 = vadd.f32 %v264_v7, %v262_v6 }
  0xc4   : > { %267 = vst.msk [vmem:[%s247_s18] sm:$0xff] %vm256_vm0, %v265_v8 }
  0xc5   : > { %v272_v10 = vpop.xlane.xlu0 %271 }
  0xc6   : > { %v273_v11 = vadd.f32 %v272_v10, %v269_v9 }
  0xc8   : > { %274 = vst.msk [vmem:[%s251_s22] sm:$0xff] %vm256_vm0, %v273_v11 }
  0xcb   : > { %v279_v12 = vld [vmem:[%s247_s18] sm:$0xff] }
  0xcc   : > { %v280_v13 = vmul.f32 2.0, %v279_v12 }
  0xcf   : > { %v278_v14 = vld [vmem:[%s251_s22] sm:$0xff] }
  0xd0   : > { %v281_v15 = vsub.f32 %v278_v14, %v280_v13 }
  0xd2   : > { %282 = vst.msk [vmem:[%s251_s22] sm:$0xff] %vm256_vm0, %v281_v15 }
  0xd3 PF: > { %s20_s17 = sadd.s32 1, %s598_s17   ;;  %s765_s12 = smov %s582_s13 }
  0xd4   : > { %p17_p7 = scmp.ge.s32.totalorder %s20_s17, 4   ;;  %s766_s13 = smov %s586_s14 }
  0xd5   : > { %s767_s14 = smov %s672_s24  ;;  %s768_s15 = smov %s594_s16 }
  0xd6   : > { %s769_s16 = smov %s771_s19  ;;  %19 = sbr.rel (!%p17_p7) target bundleno = 6 (0x6), region = 101 }
  0xdb   :  { %316 = vsyncpa [#allocation3], 1 }
  0xdc   :  { %318 = vsyncpa [#allocation3 + $0x1], 1 }
  0xdd   :  { %319 = vsyncpa [#allocation5], 1 }
  0xde   :  { %321 = vsyncpa [#allocation5 + $0x1], 1 }

</bundles_post_ra>
